<compile_context>
chip_gen: v6e
topology: v6e:2x2x1
jax: 0.10.0
libtpu: 0.0.40
codegen_flags: <defaults>
</compile_context>

<pallas_src>
import functools

import jax
import jax.numpy as jnp
from jax.experimental import pallas as pl
from jax.experimental.pallas import tpu as pltpu


def _attention_kernel(*refs, heads, dim_head, bias_heads):
    """grid = (B, N//tq, M//tk); axis 2 is the sequential KV reduction.

    refs (no bias):   xq, xc, wq, wkv, wo, o, q_sc, m_sc, l_sc, acc_sc
    refs (with bias): xq, xc, wq, wkv, wo, bias, o, q_sc, m_sc, l_sc, acc_sc

    xq_ref  : (1, tq, D)       pre-normalized query-token tile
    xc_ref  : (1, tk, D)       pre-normalized context-token tile
    wq_ref  : (D, H*Dh)        query projection (softmax scale pre-folded)
    wkv_ref : (D, 2*H*Dh)      fused key/value projection ([:, :H*Dh] = K)
    wo_ref  : (H*Dh, D)        output projection
    bias_ref: (1, Hb, tq, tk)  optional rel_pos_bias tile (Hb == 1 or H)
    o_ref   : (1, tq, D)       output tile (written once, at the last KV step)
    q_sc    : (tq, H*Dh)       cached projected Q (matmul dtype)
    m_sc    : (H, tq, 1)       per-head running max        (f32)
    l_sc    : (H, tq, 1)       per-head running denominator (f32)
    acc_sc  : (H, tq, Dh)      per-head running numerator   (f32)
    """
    if bias_heads is None:
        (xq_ref, xc_ref, wq_ref, wkv_ref, wo_ref,
         o_ref, q_sc, m_sc, l_sc, acc_sc) = refs
        bias_ref = None
    else:
        (xq_ref, xc_ref, wq_ref, wkv_ref, wo_ref, bias_ref,
         o_ref, q_sc, m_sc, l_sc, acc_sc) = refs

    H, Dh = heads, dim_head
    inner = H * Dh
    mm_dtype = wq_ref.dtype
    ki = pl.program_id(2)

    # ---- per-(b, q-tile) init: project Q once, reset online-softmax state ----
    @pl.when(ki == 0)
    def _init():
        q = jax.lax.dot_general(xq_ref[0], wq_ref[...], (((1,), (0,)), ((), ())),
                                preferred_element_type=jnp.float32)    # (tq, H*Dh)
        q_sc[...] = q.astype(q_sc.dtype)
        m_sc[...] = jnp.full_like(m_sc, -jnp.inf)
        l_sc[...] = jnp.zeros_like(l_sc)
        acc_sc[...] = jnp.zeros_like(acc_sc)

    # ---- fused K/V projection for this KV tile (single MXU launch) ----
    kv = jax.lax.dot_general(xc_ref[0], wkv_ref[...], (((1,), (0,)), ((), ())),
                             preferred_element_type=jnp.float32)       # (tk, 2*H*Dh)
    kv = kv.astype(mm_dtype)          # cast ONCE (hoisted out of the head loop)
    q_all = q_sc[...]                 # (tq, H*Dh), already in matmul dtype

    # ---- per-head online-softmax update (H is small -> static unroll) ----
    for h in range(H):
        qh = q_all[:, h * Dh:(h + 1) * Dh]                              # (tq, Dh)
        kh = kv[:, h * Dh:(h + 1) * Dh]                                 # (tk, Dh)
        vh = kv[:, inner + h * Dh: inner + (h + 1) * Dh]                # (tk, Dh)

        # contract last dims of both -> no transpose / relayout of K
        sim = jax.lax.dot_general(qh, kh, (((1,), (1,)), ((), ())),
                                  preferred_element_type=jnp.float32)   # (tq, tk)
        if bias_heads is not None:
            bh = h if bias_heads > 1 else 0
            sim = sim + bias_ref[0, bh].astype(jnp.float32)

        m_prev = m_sc[h]                                                # (tq, 1)
        m_new = jnp.maximum(m_prev, jnp.max(sim, axis=-1, keepdims=True))
        alpha = jnp.exp(m_prev - m_new)
        p = jnp.exp(sim - m_new)
        l_sc[h] = alpha * l_sc[h] + jnp.sum(p, axis=-1, keepdims=True)
        acc_sc[h] = alpha * acc_sc[h] + jax.lax.dot_general(
            p.astype(mm_dtype), vh, (((1,), (0,)), ((), ())),
            preferred_element_type=jnp.float32)                         # (tq, Dh)
        m_sc[h] = m_new

    # ---- finalize: normalize and accumulate per head into the projection ----
    @pl.when(ki == pl.num_programs(2) - 1)
    def _finalize():
        tq, D = o_ref.shape[1], o_ref.shape[2]
        proj = jnp.zeros((tq, D), jnp.float32)
        for h in range(H):
            # reciprocal goes to the EUP slot (nearly free)
            oh = acc_sc[h] * pl.reciprocal(l_sc[h], approx=True)        # (tq, Dh)
            proj = proj + jax.lax.dot_general(
                oh.astype(mm_dtype), wo_ref[h * Dh:(h + 1) * Dh, :],
                (((1,), (0,)), ((), ())),
                preferred_element_type=jnp.float32)                     # (tq, D)
        o_ref[...] = proj.astype(o_ref.dtype)[None]


def _pick_tile(n, target=128):
    """Largest convenient tile: full extent if small / not divisible, else 128."""
    if n <= target or n % target != 0:
        return n
    return target


def _vmem_limit_bytes():
    """Generation-aware VMEM budget (headroom on v7x, big tiles on v5e/v6e)."""
    try:
        cap = int(pltpu.get_tpu_info().vmem_capacity_bytes)
    except Exception:
        cap = 64 * 1024 * 1024
    return int(min(max(cap - 16 * 1024 * 1024, 32 * 1024 * 1024),
                   100 * 1024 * 1024))


def attention_pallas(x, params, *, heads, dim_head, context=None,
                     rel_pos_bias=None, framerate=None,
                     compute_dtype=jnp.bfloat16, q_block=None, kv_block=None):
    """Forward pass of the PyTorch `Attention` module.

    params = (g, wq, wkv, wo, pos_emb, fr_emb) with
      wq  : (D, H*Dh)    == to_q.weight.T
      wkv : (D, 2*H*Dh)  == to_kv.weight.T  (first H*Dh cols = K, rest = V)
      wo  : (H*Dh, D)    == to_out.weight.T
    """
    g, wq, wkv, wo, pos_emb, fr_emb = params
    x = x.astype(jnp.float32)
    B, N, D = x.shape
    H, Dh = heads, dim_head
    inner = H * Dh

    # --- glue (plain JAX): positional / framerate embeddings ---
    if framerate is not None:
        x = x + pos_emb[:, :N]                       # broadcast over batch
        x = x + fr_emb[:, framerate - 1:framerate]   # broadcast over batch, tokens

    # --- token-axis LayerNorm hoisted out of the kernel (done once, f32) ---
    eps = 1e-5  # x promoted to f32 (torch: 1e-5 for f32); clamp matches torch

    def layer_norm(t):
        mean = jnp.mean(t, axis=1, keepdims=True)
        var = jnp.mean((t - mean) ** 2, axis=1, keepdims=True)
        return (t - mean) * jax.lax.rsqrt(jnp.maximum(var, eps)) * g

    xn = layer_norm(x)
    if context is None:
        cn = xn                                      # skip redundant second LN
    else:
        cn = layer_norm(context.astype(jnp.float32))
    M = cn.shape[1]

    # fold the softmax scale into Wq once (outside the grid)
    wq_s = wq * (dim_head ** -0.5)

    # matmul operands in compute dtype (bf16 default: MXU-native on all gens);
    # LN above and all softmax math inside the kernel stay f32.
    xn_c = xn.astype(compute_dtype)
    cn_c = xn_c if context is None else cn.astype(compute_dtype)
    wq_c = wq_s.astype(compute_dtype)
    wkv_c = wkv.astype(compute_dtype)
    wo_c = wo.astype(compute_dtype)

    tq = q_block if q_block is not None else _pick_tile(N)
    tk = kv_block if kv_block is not None else _pick_tile(M)
    assert N % tq == 0 and M % tk == 0, "tile sizes must divide N / M"
    assert tq == N or tq % 8 == 0, "query tile must be a multiple of 8 or full N"
    assert tk == M or tk % 8 == 0, "kv tile must be a multiple of 8 or full M"
    grid = (B, N // tq, M // tk)

    in_specs = [
        pl.BlockSpec((1, tq, D), lambda b, qi, ki: (b, qi, 0)),      # query tokens
        pl.BlockSpec((1, tk, D), lambda b, qi, ki: (b, ki, 0)),      # context tokens
        pl.BlockSpec((D, inner), lambda b, qi, ki: (0, 0)),          # Wq (scaled)
        pl.BlockSpec((D, 2 * inner), lambda b, qi, ki: (0, 0)),      # Wkv fused
        pl.BlockSpec((inner, D), lambda b, qi, ki: (0, 0)),          # Wout
    ]
    args = [xn_c, cn_c, wq_c, wkv_c, wo_c]

    bias_heads = None
    if rel_pos_bias is not None:
        bias = jnp.asarray(rel_pos_bias, jnp.float32)
        while bias.ndim < 4:                                  # (N,M)->(1,1,N,M) etc.
            bias = bias[None]
        Bb, Hb = bias.shape[0], bias.shape[1]
        if Bb not in (1, B):
            raise ValueError(f"rel_pos_bias batch dim {Bb} incompatible with B={B}")
        if tk != M and tk % 128 != 0:
            raise ValueError("with rel_pos_bias the KV tile must be a multiple of "
                             "128 or the full context length")
        bias_heads = Hb
        if Bb > 1:
            bias_index = lambda b, qi, ki: (b, 0, qi, ki)
        else:
            bias_index = lambda b, qi, ki: (0, 0, qi, ki)     # shared across batch
        in_specs.append(pl.BlockSpec((1, Hb, tq, tk), bias_index))
        args.append(bias)

    kernel = functools.partial(_attention_kernel, heads=heads,
                               dim_head=dim_head, bias_heads=bias_heads)

    out = pl.pallas_call(
        kernel,
        out_shape=jax.ShapeDtypeStruct((B, N, D), jnp.float32),
        grid=grid,
        in_specs=in_specs,
        out_specs=pl.BlockSpec((1, tq, D), lambda b, qi, ki: (b, qi, 0)),
        scratch_shapes=[
            pltpu.VMEM((tq, inner), compute_dtype),        # cached projected Q
            pltpu.VMEM((H, tq, 1), jnp.float32),           # running max
            pltpu.VMEM((H, tq, 1), jnp.float32),           # running denominator
            pltpu.VMEM((H, tq, Dh), jnp.float32),          # running numerator
        ],
        compiler_params=pltpu.CompilerParams(
            dimension_semantics=("parallel", "parallel", "arbitrary"),
            vmem_limit_bytes=_vmem_limit_bytes(),
        ),
    )(*args)
    return out


def init_params(key, dim, heads, dim_head):
    inner = heads * dim_head
    k1, k2, k3, k4, k5 = jax.random.split(key, 5)
    g = jnp.ones((dim,), jnp.float32)                               # LayerNorm.g
    # torch Linear: y = x @ W.T ; we store the transposed (in, out) matrices.
    wq = (jax.random.normal(k1, (dim, inner)) * 0.02).astype(jnp.float32)
    wkv = (jax.random.normal(k2, (dim, 2 * inner)) * 0.02).astype(jnp.float32)
    # NOTE: the PyTorch module zero-inits to_out; we use small nonzero values
    # so the numeric check below is non-trivial.
    wo = (jax.random.normal(k3, (inner, dim)) * 0.02).astype(jnp.float32)
    pos_emb = jax.random.normal(k4, (1, 30, dim)).astype(jnp.float32)
    fr_emb = jax.random.normal(k5, (1, 30, dim)).astype(jnp.float32)
    return (g, wq, wkv, wo, pos_emb, fr_emb)


def attention_reference(x, g, wq, wkv, wo, pos_emb, fr_emb, *, heads, dim_head,
                        context=None, rel_pos_bias=None, framerate=None):
    """Pure-JAX transcription of the PyTorch forward (for validation)."""
    if framerate is not None:
        x = x + pos_emb[:, :x.shape[1]]
        x = x + fr_emb[:, framerate - 1:framerate]
    if context is None:
        context = x

    def ln(t):
        mean = jnp.mean(t, axis=1, keepdims=True)
        var = jnp.mean((t - mean) ** 2, axis=1, keepdims=True)
        return (t - mean) * jax.lax.rsqrt(jnp.maximum(var, 1e-5)) * g

    xn, cn = ln(x), ln(context)
    inner = heads * dim_head
    q = xn @ wq
    k = cn @ wkv[:, :inner]
    v = cn @ wkv[:, inner:]
    B, N, _ = q.shape
    M = k.shape[1]
    q = q.reshape(B, N, heads, dim_head).transpose(0, 2, 1, 3) * dim_head ** -0.5
    k = k.reshape(B, M, heads, dim_head).transpose(0, 2, 1, 3)
    v = v.reshape(B, M, heads, dim_head).transpose(0, 2, 1, 3)
    sim = jnp.einsum('bhid,bhjd->bhij', q, k)
    if rel_pos_bias is not None:
        sim = sim + rel_pos_bias
    attn = jax.nn.softmax(sim, axis=-1)
    out = jnp.einsum('bhij,bhjd->bhid', attn, v)
    out = out.transpose(0, 2, 1, 3).reshape(B, N, inner)
    return out @ wo


if __name__ == "__main__":
    B, N, dim = 2, 8, 32
    heads, dim_head = 4, 16
    framerate = 3

    key = jax.random.PRNGKey(0)
    kx, kp, kc, kb = jax.random.split(key, 4)
    x = jax.random.normal(kx, (B, N, dim), dtype=jnp.float32)

    params = init_params(kp, dim, heads, dim_head)
    g, wq, wkv, wo, pos_emb, fr_emb = params

    # 1) self-attention + framerate embeddings, f32 matmuls (tight check)
    out = attention_pallas(x, params, heads=heads, dim_head=dim_head,
                           framerate=framerate, compute_dtype=jnp.float32)
    out = jax.block_until_ready(out)
    ref = attention_reference(x, g, wq, wkv, wo, pos_emb, fr_emb,
                              heads=heads, dim_head=dim_head,
                              framerate=framerate)
    assert out.shape == (B, N, dim)
    assert jnp.allclose(out, ref, rtol=5e-3, atol=2e-4), (
        f"f32 max abs err {jnp.max(jnp.abs(out - ref))}")

    # 2) cross-attention + shared rel_pos_bias, default bf16 matmuls
    M = 16
    ctx = jax.random.normal(kc, (B, M, dim), dtype=jnp.float32)
    bias = 0.5 * jax.random.normal(kb, (1, 1, N, M), dtype=jnp.float32)
    out_b = attention_pallas(x, params, heads=heads, dim_head=dim_head,
                             context=ctx, rel_pos_bias=bias)
    out_b = jax.block_until_ready(out_b)
    ref_b = attention_reference(x, g, wq, wkv, wo, pos_emb, fr_emb,
                                heads=heads, dim_head=dim_head,
                                context=ctx, rel_pos_bias=bias)
    assert jnp.allclose(out_b, ref_b, rtol=5e-2, atol=5e-3), (
        f"bf16 max abs err {jnp.max(jnp.abs(out_b - ref_b))}")

    # 3) cross-attention, f32, KV axis split into 2 tiles -> exercises the
    #    online-softmax (flash) accumulation across KV grid steps
    out_t = attention_pallas(x, params, heads=heads, dim_head=dim_head,
                             context=ctx, compute_dtype=jnp.float32,
                             kv_block=8)
    out_t = jax.block_until_ready(out_t)
    ref_t = attention_reference(x, g, wq, wkv, wo, pos_emb, fr_emb,
                                heads=heads, dim_head=dim_head, context=ctx)
    assert jnp.allclose(out_t, ref_t, rtol=5e-3, atol=2e-4), (
        f"flash-tiled max abs err {jnp.max(jnp.abs(out_t - ref_t))}")

    print("KERNEL_OK")
</pallas_src>

<mosaic_0001>
module attributes {stable_mosaic.version = 11 : i64} {
  func.func @_attention_kernel(%arg0: i32, %arg1: i32, %arg2: i32, %arg3: memref<1x8x32xf32, #tpu.memory_space<vmem>>, %arg4: memref<1x8x32xf32, #tpu.memory_space<vmem>>, %arg5: memref<32x64xf32, #tpu.memory_space<vmem>>, %arg6: memref<32x128xf32, #tpu.memory_space<vmem>>, %arg7: memref<64x32xf32, #tpu.memory_space<vmem>>, %arg8: memref<1x8x32xf32, #tpu.memory_space<vmem>>, %arg9: memref<8x64xf32, #tpu.memory_space<vmem>>, %arg10: memref<4x8x1xf32, #tpu.memory_space<vmem>>, %arg11: memref<4x8x1xf32, #tpu.memory_space<vmem>>, %arg12: memref<4x8x16xf32, #tpu.memory_space<vmem>>) attributes {dimension_semantics = [#tpu.dimension_semantics<parallel>, #tpu.dimension_semantics<parallel>, #tpu.dimension_semantics<arbitrary>], iteration_bounds = array<i64: 2, 1, 1>, scalar_prefetch = 0 : i64, scratch_operands = 4 : i64, tpu.core_type = #tpu.core_type<tc>, window_params = [{transform_indices = @transform_0, window_bounds = array<i64: 1, 8, 32>}, {transform_indices = @transform_1, window_bounds = array<i64: 1, 8, 32>}, {pipeline_mode = #tpu.pipeline_mode<synchronous>, transform_indices = @transform_2, window_bounds = array<i64: 32, 64>}, {pipeline_mode = #tpu.pipeline_mode<synchronous>, transform_indices = @transform_3, window_bounds = array<i64: 32, 128>}, {pipeline_mode = #tpu.pipeline_mode<synchronous>, transform_indices = @transform_4, window_bounds = array<i64: 64, 32>}, {transform_indices = @transform_5, window_bounds = array<i64: 1, 8, 32>}]} {
    %c0_i32 = arith.constant 0 : i32
    %0 = arith.cmpi eq, %arg2, %c0_i32 : i32
    %1 = arith.extui %0 : i1 to i32
    %c0_i32_0 = arith.constant 0 : i32
    %2 = arith.cmpi ne, %1, %c0_i32_0 : i32
    scf.if %2 {
      %c0_94 = arith.constant 0 : index
      %c0_95 = arith.constant 0 : index
      %c0_96 = arith.constant 0 : index
      %151 = vector.load %arg3[%c0_94, %c0_95, %c0_96] : memref<1x8x32xf32, #tpu.memory_space<vmem>>, vector<1x8x32xf32>
      %152 = vector.shape_cast %151 : vector<1x8x32xf32> to vector<8x32xf32>
      %c0_97 = arith.constant 0 : index
      %c0_98 = arith.constant 0 : index
      %153 = vector.load %arg5[%c0_97, %c0_98] : memref<32x64xf32, #tpu.memory_space<vmem>>, vector<32x64xf32>
      %cst_99 = arith.constant dense<0.000000e+00> : vector<8x64xf32>
      %154 = tpu.matmul %152, %153, %cst_99 {dimension_numbers = #tpu.dot_dimension_numbers<[1], [0], [0], [1], [0, 0, 1, 1], [], []>} : vector<8x32xf32>, vector<32x64xf32>, vector<8x64xf32> -> vector<8x64xf32>
      %c0_100 = arith.constant 0 : index
      %c0_101 = arith.constant 0 : index
      %155 = vector.load %arg9[%c0_100, %c0_101] : memref<8x64xf32, #tpu.memory_space<vmem>>, vector<8x64xf32>
      tpu.vector_store %arg9[%c0_100, %c0_101], %154 {strides = array<i32>} : memref<8x64xf32, #tpu.memory_space<vmem>>, vector<8x64xf32>,
      %cst_102 = arith.constant 0xFF800000 : f32
      %156 = vector.broadcast %cst_102 : f32 to vector<4x8x1xf32>
      %c0_103 = arith.constant 0 : index
      %c0_104 = arith.constant 0 : index
      %c0_105 = arith.constant 0 : index
      %157 = vector.load %arg10[%c0_103, %c0_104, %c0_105] : memref<4x8x1xf32, #tpu.memory_space<vmem>>, vector<4x8x1xf32>
      tpu.vector_store %arg10[%c0_103, %c0_104, %c0_105], %156 {strides = array<i32>} : memref<4x8x1xf32, #tpu.memory_space<vmem>>, vector<4x8x1xf32>,
      %cst_106 = arith.constant 0.000000e+00 : f32
      %158 = vector.broadcast %cst_106 : f32 to vector<4x8x1xf32>
      %c0_107 = arith.constant 0 : index
      %c0_108 = arith.constant 0 : index
      %c0_109 = arith.constant 0 : index
      %159 = vector.load %arg11[%c0_107, %c0_108, %c0_109] : memref<4x8x1xf32, #tpu.memory_space<vmem>>, vector<4x8x1xf32>
      tpu.vector_store %arg11[%c0_107, %c0_108, %c0_109], %158 {strides = array<i32>} : memref<4x8x1xf32, #tpu.memory_space<vmem>>, vector<4x8x1xf32>,
      %cst_110 = arith.constant 0.000000e+00 : f32
      %160 = vector.broadcast %cst_110 : f32 to vector<4x8x16xf32>
      %c0_111 = arith.constant 0 : index
      %c0_112 = arith.constant 0 : index
      %c0_113 = arith.constant 0 : index
      %161 = vector.load %arg12[%c0_111, %c0_112, %c0_113] : memref<4x8x16xf32, #tpu.memory_space<vmem>>, vector<4x8x16xf32>
      tpu.vector_store %arg12[%c0_111, %c0_112, %c0_113], %160 {strides = array<i32>} : memref<4x8x16xf32, #tpu.memory_space<vmem>>, vector<4x8x16xf32>,
    } else {
    }
    %c0 = arith.constant 0 : index
    %c0_1 = arith.constant 0 : index
    %c0_2 = arith.constant 0 : index
    %3 = vector.load %arg4[%c0, %c0_1, %c0_2] : memref<1x8x32xf32, #tpu.memory_space<vmem>>, vector<1x8x32xf32>
    %4 = vector.shape_cast %3 : vector<1x8x32xf32> to vector<8x32xf32>
    %c0_3 = arith.constant 0 : index
    %c0_4 = arith.constant 0 : index
    %5 = vector.load %arg6[%c0_3, %c0_4] : memref<32x128xf32, #tpu.memory_space<vmem>>, vector<32x128xf32>
    %cst = arith.constant dense<0.000000e+00> : vector<8x128xf32>
    %6 = tpu.matmul %4, %5, %cst {dimension_numbers = #tpu.dot_dimension_numbers<[1], [0], [0], [1], [0, 0, 1, 1], [], []>} : vector<8x32xf32>, vector<32x128xf32>, vector<8x128xf32> -> vector<8x128xf32>
    %c0_5 = arith.constant 0 : index
    %c0_6 = arith.constant 0 : index
    %7 = vector.load %arg9[%c0_5, %c0_6] : memref<8x64xf32, #tpu.memory_space<vmem>>, vector<8x64xf32>
    %8 = vector.extract_strided_slice %7 {offsets = [0, 0], sizes = [8, 16], strides = [1, 1]} : vector<8x64xf32> to vector<8x16xf32>
    %9 = vector.extract_strided_slice %6 {offsets = [0, 0], sizes = [8, 16], strides = [1, 1]} : vector<8x128xf32> to vector<8x16xf32>
    %10 = vector.extract_strided_slice %6 {offsets = [0, 64], sizes = [8, 16], strides = [1, 1]} : vector<8x128xf32> to vector<8x16xf32>
    %cst_7 = arith.constant dense<0.000000e+00> : vector<8x8xf32>
    %11 = tpu.matmul %8, %9, %cst_7 {dimension_numbers = #tpu.dot_dimension_numbers<[1], [1], [0], [0], [0, 0, 1, 0], [], []>} : vector<8x16xf32>, vector<8x16xf32>, vector<8x8xf32> -> vector<8x8xf32>
    %c0_8 = arith.constant 0 : index
    %c0_9 = arith.constant 0 : index
    %c0_10 = arith.constant 0 : index
    %12 = vector.load %arg10[%c0_8, %c0_9, %c0_10] : memref<4x8x1xf32, #tpu.memory_space<vmem>>, vector<1x8x1xf32>
    %13 = vector.shape_cast %12 : vector<1x8x1xf32> to vector<8x1xf32>
    %cst_11 = arith.constant dense<0xFF800000> : vector<8xf32>
    %14 = vector.multi_reduction <maximumf>, %11, %cst_11 [1] : vector<8x8xf32> to vector<8xf32>
    %15 = vector.shape_cast %14 : vector<8xf32> to vector<8x1xf32>
    %16 = arith.maximumf %13, %15 : vector<8x1xf32>
    %17 = arith.subf %13, %16 : vector<8x1xf32>
    %18 = math.exp %17 : vector<8x1xf32>
    %19 = vector.broadcast %16 : vector<8x1xf32> to vector<8x8xf32>
    %20 = arith.subf %11, %19 : vector<8x8xf32>
    %21 = math.exp %20 : vector<8x8xf32>
    %c0_12 = arith.constant 0 : index
    %c0_13 = arith.constant 0 : index
    %c0_14 = arith.constant 0 : index
    %22 = vector.load %arg11[%c0_12, %c0_13, %c0_14] : memref<4x8x1xf32, #tpu.memory_space<vmem>>, vector<1x8x1xf32>
    %23 = vector.shape_cast %22 : vector<1x8x1xf32> to vector<8x1xf32>
    %24 = arith.mulf %18, %23 : vector<8x1xf32>
    %cst_15 = arith.constant dense<0.000000e+00> : vector<8xf32>
    %25 = vector.multi_reduction <add>, %21, %cst_15 [1] : vector<8x8xf32> to vector<8xf32>
    %26 = vector.shape_cast %25 : vector<8xf32> to vector<8x1xf32>
    %27 = arith.addf %24, %26 : vector<8x1xf32>
    %c0_16 = arith.constant 0 : index
    %c0_17 = arith.constant 0 : index
    %c0_18 = arith.constant 0 : index
    %28 = vector.load %arg11[%c0_16, %c0_17, %c0_18] : memref<4x8x1xf32, #tpu.memory_space<vmem>>, vector<1x8x1xf32>
    %29 = vector.shape_cast %28 : vector<1x8x1xf32> to vector<8x1xf32>
    %30 = vector.shape_cast %27 : vector<8x1xf32> to vector<1x8x1xf32>
    tpu.vector_store %arg11[%c0_16, %c0_17, %c0_18], %30 {strides = array<i32>} : memref<4x8x1xf32, #tpu.memory_space<vmem>>, vector<1x8x1xf32>,
    %c0_19 = arith.constant 0 : index
    %c0_20 = arith.constant 0 : index
    %c0_21 = arith.constant 0 : index
    %31 = vector.load %arg12[%c0_19, %c0_20, %c0_21] : memref<4x8x16xf32, #tpu.memory_space<vmem>>, vector<1x8x16xf32>
    %32 = vector.shape_cast %31 : vector<1x8x16xf32> to vector<8x16xf32>
    %33 = vector.broadcast %18 : vector<8x1xf32> to vector<8x16xf32>
    %34 = arith.mulf %33, %32 : vector<8x16xf32>
    %cst_22 = arith.constant dense<0.000000e+00> : vector<8x16xf32>
    %35 = tpu.matmul %21, %10, %cst_22 {dimension_numbers = #tpu.dot_dimension_numbers<[1], [0], [0], [1], [0, 0, 1, 1], [], []>} : vector<8x8xf32>, vector<8x16xf32>, vector<8x16xf32> -> vector<8x16xf32>
    %36 = arith.addf %34, %35 : vector<8x16xf32>
    %c0_23 = arith.constant 0 : index
    %c0_24 = arith.constant 0 : index
    %c0_25 = arith.constant 0 : index
    %37 = vector.load %arg12[%c0_23, %c0_24, %c0_25] : memref<4x8x16xf32, #tpu.memory_space<vmem>>, vector<1x8x16xf32>
    %38 = vector.shape_cast %37 : vector<1x8x16xf32> to vector<8x16xf32>
    %39 = vector.shape_cast %36 : vector<8x16xf32> to vector<1x8x16xf32>
    tpu.vector_store %arg12[%c0_23, %c0_24, %c0_25], %39 {strides = array<i32>} : memref<4x8x16xf32, #tpu.memory_space<vmem>>, vector<1x8x16xf32>,
    %c0_26 = arith.constant 0 : index
    %c0_27 = arith.constant 0 : index
    %c0_28 = arith.constant 0 : index
    %40 = vector.load %arg10[%c0_26, %c0_27, %c0_28] : memref<4x8x1xf32, #tpu.memory_space<vmem>>, vector<1x8x1xf32>
    %41 = vector.shape_cast %40 : vector<1x8x1xf32> to vector<8x1xf32>
    %42 = vector.shape_cast %16 : vector<8x1xf32> to vector<1x8x1xf32>
    tpu.vector_store %arg10[%c0_26, %c0_27, %c0_28], %42 {strides = array<i32>} : memref<4x8x1xf32, #tpu.memory_space<vmem>>, vector<1x8x1xf32>,
    %43 = vector.extract_strided_slice %7 {offsets = [0, 16], sizes = [8, 16], strides = [1, 1]} : vector<8x64xf32> to vector<8x16xf32>
    %44 = vector.extract_strided_slice %6 {offsets = [0, 16], sizes = [8, 16], strides = [1, 1]} : vector<8x128xf32> to vector<8x16xf32>
    %45 = vector.extract_strided_slice %6 {offsets = [0, 80], sizes = [8, 16], strides = [1, 1]} : vector<8x128xf32> to vector<8x16xf32>
    %cst_29 = arith.constant dense<0.000000e+00> : vector<8x8xf32>
    %46 = tpu.matmul %43, %44, %cst_29 {dimension_numbers = #tpu.dot_dimension_numbers<[1], [1], [0], [0], [0, 0, 1, 0], [], []>} : vector<8x16xf32>, vector<8x16xf32>, vector<8x8xf32> -> vector<8x8xf32>
    %c1 = arith.constant 1 : index
    %c0_30 = arith.constant 0 : index
    %c0_31 = arith.constant 0 : index
    %47 = vector.load %arg10[%c1, %c0_30, %c0_31] : memref<4x8x1xf32, #tpu.memory_space<vmem>>, vector<1x8x1xf32>
    %48 = vector.shape_cast %47 : vector<1x8x1xf32> to vector<8x1xf32>
    %cst_32 = arith.constant dense<0xFF800000> : vector<8xf32>
    %49 = vector.multi_reduction <maximumf>, %46, %cst_32 [1] : vector<8x8xf32> to vector<8xf32>
    %50 = vector.shape_cast %49 : vector<8xf32> to vector<8x1xf32>
    %51 = arith.maximumf %48, %50 : vector<8x1xf32>
    %52 = arith.subf %48, %51 : vector<8x1xf32>
    %53 = math.exp %52 : vector<8x1xf32>
    %54 = vector.broadcast %51 : vector<8x1xf32> to vector<8x8xf32>
    %55 = arith.subf %46, %54 : vector<8x8xf32>
    %56 = math.exp %55 : vector<8x8xf32>
    %c1_33 = arith.constant 1 : index
    %c0_34 = arith.constant 0 : index
    %c0_35 = arith.constant 0 : index
    %57 = vector.load %arg11[%c1_33, %c0_34, %c0_35] : memref<4x8x1xf32, #tpu.memory_space<vmem>>, vector<1x8x1xf32>
    %58 = vector.shape_cast %57 : vector<1x8x1xf32> to vector<8x1xf32>
    %59 = arith.mulf %53, %58 : vector<8x1xf32>
    %cst_36 = arith.constant dense<0.000000e+00> : vector<8xf32>
    %60 = vector.multi_reduction <add>, %56, %cst_36 [1] : vector<8x8xf32> to vector<8xf32>
    %61 = vector.shape_cast %60 : vector<8xf32> to vector<8x1xf32>
    %62 = arith.addf %59, %61 : vector<8x1xf32>
    %c1_37 = arith.constant 1 : index
    %c0_38 = arith.constant 0 : index
    %c0_39 = arith.constant 0 : index
    %63 = vector.load %arg11[%c1_37, %c0_38, %c0_39] : memref<4x8x1xf32, #tpu.memory_space<vmem>>, vector<1x8x1xf32>
    %64 = vector.shape_cast %63 : vector<1x8x1xf32> to vector<8x1xf32>
    %65 = vector.shape_cast %62 : vector<8x1xf32> to vector<1x8x1xf32>
    tpu.vector_store %arg11[%c1_37, %c0_38, %c0_39], %65 {strides = array<i32>} : memref<4x8x1xf32, #tpu.memory_space<vmem>>, vector<1x8x1xf32>,
    %c1_40 = arith.constant 1 : index
    %c0_41 = arith.constant 0 : index
    %c0_42 = arith.constant 0 : index
    %66 = vector.load %arg12[%c1_40, %c0_41, %c0_42] : memref<4x8x16xf32, #tpu.memory_space<vmem>>, vector<1x8x16xf32>
    %67 = vector.shape_cast %66 : vector<1x8x16xf32> to vector<8x16xf32>
    %68 = vector.broadcast %53 : vector<8x1xf32> to vector<8x16xf32>
    %69 = arith.mulf %68, %67 : vector<8x16xf32>
    %cst_43 = arith.constant dense<0.000000e+00> : vector<8x16xf32>
    %70 = tpu.matmul %56, %45, %cst_43 {dimension_numbers = #tpu.dot_dimension_numbers<[1], [0], [0], [1], [0, 0, 1, 1], [], []>} : vector<8x8xf32>, vector<8x16xf32>, vector<8x16xf32> -> vector<8x16xf32>
    %71 = arith.addf %69, %70 : vector<8x16xf32>
    %c1_44 = arith.constant 1 : index
    %c0_45 = arith.constant 0 : index
    %c0_46 = arith.constant 0 : index
    %72 = vector.load %arg12[%c1_44, %c0_45, %c0_46] : memref<4x8x16xf32, #tpu.memory_space<vmem>>, vector<1x8x16xf32>
    %73 = vector.shape_cast %72 : vector<1x8x16xf32> to vector<8x16xf32>
    %74 = vector.shape_cast %71 : vector<8x16xf32> to vector<1x8x16xf32>
    tpu.vector_store %arg12[%c1_44, %c0_45, %c0_46], %74 {strides = array<i32>} : memref<4x8x16xf32, #tpu.memory_space<vmem>>, vector<1x8x16xf32>,
    %c1_47 = arith.constant 1 : index
    %c0_48 = arith.constant 0 : index
    %c0_49 = arith.constant 0 : index
    %75 = vector.load %arg10[%c1_47, %c0_48, %c0_49] : memref<4x8x1xf32, #tpu.memory_space<vmem>>, vector<1x8x1xf32>
    %76 = vector.shape_cast %75 : vector<1x8x1xf32> to vector<8x1xf32>
    %77 = vector.shape_cast %51 : vector<8x1xf32> to vector<1x8x1xf32>
    tpu.vector_store %arg10[%c1_47, %c0_48, %c0_49], %77 {strides = array<i32>} : memref<4x8x1xf32, #tpu.memory_space<vmem>>, vector<1x8x1xf32>,
    %78 = vector.extract_strided_slice %7 {offsets = [0, 32], sizes = [8, 16], strides = [1, 1]} : vector<8x64xf32> to vector<8x16xf32>
    %79 = vector.extract_strided_slice %6 {offsets = [0, 32], sizes = [8, 16], strides = [1, 1]} : vector<8x128xf32> to vector<8x16xf32>
    %80 = vector.extract_strided_slice %6 {offsets = [0, 96], sizes = [8, 16], strides = [1, 1]} : vector<8x128xf32> to vector<8x16xf32>
    %cst_50 = arith.constant dense<0.000000e+00> : vector<8x8xf32>
    %81 = tpu.matmul %78, %79, %cst_50 {dimension_numbers = #tpu.dot_dimension_numbers<[1], [1], [0], [0], [0, 0, 1, 0], [], []>} : vector<8x16xf32>, vector<8x16xf32>, vector<8x8xf32> -> vector<8x8xf32>
    %c2 = arith.constant 2 : index
    %c0_51 = arith.constant 0 : index
    %c0_52 = arith.constant 0 : index
    %82 = vector.load %arg10[%c2, %c0_51, %c0_52] : memref<4x8x1xf32, #tpu.memory_space<vmem>>, vector<1x8x1xf32>
    %83 = vector.shape_cast %82 : vector<1x8x1xf32> to vector<8x1xf32>
    %cst_53 = arith.constant dense<0xFF800000> : vector<8xf32>
    %84 = vector.multi_reduction <maximumf>, %81, %cst_53 [1] : vector<8x8xf32> to vector<8xf32>
    %85 = vector.shape_cast %84 : vector<8xf32> to vector<8x1xf32>
    %86 = arith.maximumf %83, %85 : vector<8x1xf32>
    %87 = arith.subf %83, %86 : vector<8x1xf32>
    %88 = math.exp %87 : vector<8x1xf32>
    %89 = vector.broadcast %86 : vector<8x1xf32> to vector<8x8xf32>
    %90 = arith.subf %81, %89 : vector<8x8xf32>
    %91 = math.exp %90 : vector<8x8xf32>
    %c2_54 = arith.constant 2 : index
    %c0_55 = arith.constant 0 : index
    %c0_56 = arith.constant 0 : index
    %92 = vector.load %arg11[%c2_54, %c0_55, %c0_56] : memref<4x8x1xf32, #tpu.memory_space<vmem>>, vector<1x8x1xf32>
    %93 = vector.shape_cast %92 : vector<1x8x1xf32> to vector<8x1xf32>
    %94 = arith.mulf %88, %93 : vector<8x1xf32>
    %cst_57 = arith.constant dense<0.000000e+00> : vector<8xf32>
    %95 = vector.multi_reduction <add>, %91, %cst_57 [1] : vector<8x8xf32> to vector<8xf32>
    %96 = vector.shape_cast %95 : vector<8xf32> to vector<8x1xf32>
    %97 = arith.addf %94, %96 : vector<8x1xf32>
    %c2_58 = arith.constant 2 : index
    %c0_59 = arith.constant 0 : index
    %c0_60 = arith.constant 0 : index
    %98 = vector.load %arg11[%c2_58, %c0_59, %c0_60] : memref<4x8x1xf32, #tpu.memory_space<vmem>>, vector<1x8x1xf32>
    %99 = vector.shape_cast %98 : vector<1x8x1xf32> to vector<8x1xf32>
    %100 = vector.shape_cast %97 : vector<8x1xf32> to vector<1x8x1xf32>
    tpu.vector_store %arg11[%c2_58, %c0_59, %c0_60], %100 {strides = array<i32>} : memref<4x8x1xf32, #tpu.memory_space<vmem>>, vector<1x8x1xf32>,
    %c2_61 = arith.constant 2 : index
    %c0_62 = arith.constant 0 : index
    %c0_63 = arith.constant 0 : index
    %101 = vector.load %arg12[%c2_61, %c0_62, %c0_63] : memref<4x8x16xf32, #tpu.memory_space<vmem>>, vector<1x8x16xf32>
    %102 = vector.shape_cast %101 : vector<1x8x16xf32> to vector<8x16xf32>
    %103 = vector.broadcast %88 : vector<8x1xf32> to vector<8x16xf32>
    %104 = arith.mulf %103, %102 : vector<8x16xf32>
    %cst_64 = arith.constant dense<0.000000e+00> : vector<8x16xf32>
    %105 = tpu.matmul %91, %80, %cst_64 {dimension_numbers = #tpu.dot_dimension_numbers<[1], [0], [0], [1], [0, 0, 1, 1], [], []>} : vector<8x8xf32>, vector<8x16xf32>, vector<8x16xf32> -> vector<8x16xf32>
    %106 = arith.addf %104, %105 : vector<8x16xf32>
    %c2_65 = arith.constant 2 : index
    %c0_66 = arith.constant 0 : index
    %c0_67 = arith.constant 0 : index
    %107 = vector.load %arg12[%c2_65, %c0_66, %c0_67] : memref<4x8x16xf32, #tpu.memory_space<vmem>>, vector<1x8x16xf32>
    %108 = vector.shape_cast %107 : vector<1x8x16xf32> to vector<8x16xf32>
    %109 = vector.shape_cast %106 : vector<8x16xf32> to vector<1x8x16xf32>
    tpu.vector_store %arg12[%c2_65, %c0_66, %c0_67], %109 {strides = array<i32>} : memref<4x8x16xf32, #tpu.memory_space<vmem>>, vector<1x8x16xf32>,
    %c2_68 = arith.constant 2 : index
    %c0_69 = arith.constant 0 : index
    %c0_70 = arith.constant 0 : index
    %110 = vector.load %arg10[%c2_68, %c0_69, %c0_70] : memref<4x8x1xf32, #tpu.memory_space<vmem>>, vector<1x8x1xf32>
    %111 = vector.shape_cast %110 : vector<1x8x1xf32> to vector<8x1xf32>
    %112 = vector.shape_cast %86 : vector<8x1xf32> to vector<1x8x1xf32>
    tpu.vector_store %arg10[%c2_68, %c0_69, %c0_70], %112 {strides = array<i32>} : memref<4x8x1xf32, #tpu.memory_space<vmem>>, vector<1x8x1xf32>,
    %113 = vector.extract_strided_slice %7 {offsets = [0, 48], sizes = [8, 16], strides = [1, 1]} : vector<8x64xf32> to vector<8x16xf32>
    %114 = vector.extract_strided_slice %6 {offsets = [0, 48], sizes = [8, 16], strides = [1, 1]} : vector<8x128xf32> to vector<8x16xf32>
    %115 = vector.extract_strided_slice %6 {offsets = [0, 112], sizes = [8, 16], strides = [1, 1]} : vector<8x128xf32> to vector<8x16xf32>
    %cst_71 = arith.constant dense<0.000000e+00> : vector<8x8xf32>
    %116 = tpu.matmul %113, %114, %cst_71 {dimension_numbers = #tpu.dot_dimension_numbers<[1], [1], [0], [0], [0, 0, 1, 0], [], []>} : vector<8x16xf32>, vector<8x16xf32>, vector<8x8xf32> -> vector<8x8xf32>
    %c3 = arith.constant 3 : index
    %c0_72 = arith.constant 0 : index
    %c0_73 = arith.constant 0 : index
    %117 = vector.load %arg10[%c3, %c0_72, %c0_73] : memref<4x8x1xf32, #tpu.memory_space<vmem>>, vector<1x8x1xf32>
    %118 = vector.shape_cast %117 : vector<1x8x1xf32> to vector<8x1xf32>
    %cst_74 = arith.constant dense<0xFF800000> : vector<8xf32>
    %119 = vector.multi_reduction <maximumf>, %116, %cst_74 [1] : vector<8x8xf32> to vector<8xf32>
    %120 = vector.shape_cast %119 : vector<8xf32> to vector<8x1xf32>
    %121 = arith.maximumf %118, %120 : vector<8x1xf32>
    %122 = arith.subf %118, %121 : vector<8x1xf32>
    %123 = math.exp %122 : vector<8x1xf32>
    %124 = vector.broadcast %121 : vector<8x1xf32> to vector<8x8xf32>
    %125 = arith.subf %116, %124 : vector<8x8xf32>
    %126 = math.exp %125 : vector<8x8xf32>
    %c3_75 = arith.constant 3 : index
    %c0_76 = arith.constant 0 : index
    %c0_77 = arith.constant 0 : index
    %127 = vector.load %arg11[%c3_75, %c0_76, %c0_77] : memref<4x8x1xf32, #tpu.memory_space<vmem>>, vector<1x8x1xf32>
    %128 = vector.shape_cast %127 : vector<1x8x1xf32> to vector<8x1xf32>
    %129 = arith.mulf %123, %128 : vector<8x1xf32>
    %cst_78 = arith.constant dense<0.000000e+00> : vector<8xf32>
    %130 = vector.multi_reduction <add>, %126, %cst_78 [1] : vector<8x8xf32> to vector<8xf32>
    %131 = vector.shape_cast %130 : vector<8xf32> to vector<8x1xf32>
    %132 = arith.addf %129, %131 : vector<8x1xf32>
    %c3_79 = arith.constant 3 : index
    %c0_80 = arith.constant 0 : index
    %c0_81 = arith.constant 0 : index
    %133 = vector.load %arg11[%c3_79, %c0_80, %c0_81] : memref<4x8x1xf32, #tpu.memory_space<vmem>>, vector<1x8x1xf32>
    %134 = vector.shape_cast %133 : vector<1x8x1xf32> to vector<8x1xf32>
    %135 = vector.shape_cast %132 : vector<8x1xf32> to vector<1x8x1xf32>
    tpu.vector_store %arg11[%c3_79, %c0_80, %c0_81], %135 {strides = array<i32>} : memref<4x8x1xf32, #tpu.memory_space<vmem>>, vector<1x8x1xf32>,
    %c3_82 = arith.constant 3 : index
    %c0_83 = arith.constant 0 : index
    %c0_84 = arith.constant 0 : index
    %136 = vector.load %arg12[%c3_82, %c0_83, %c0_84] : memref<4x8x16xf32, #tpu.memory_space<vmem>>, vector<1x8x16xf32>
    %137 = vector.shape_cast %136 : vector<1x8x16xf32> to vector<8x16xf32>
    %138 = vector.broadcast %123 : vector<8x1xf32> to vector<8x16xf32>
    %139 = arith.mulf %138, %137 : vector<8x16xf32>
    %cst_85 = arith.constant dense<0.000000e+00> : vector<8x16xf32>
    %140 = tpu.matmul %126, %115, %cst_85 {dimension_numbers = #tpu.dot_dimension_numbers<[1], [0], [0], [1], [0, 0, 1, 1], [], []>} : vector<8x8xf32>, vector<8x16xf32>, vector<8x16xf32> -> vector<8x16xf32>
    %141 = arith.addf %139, %140 : vector<8x16xf32>
    %c3_86 = arith.constant 3 : index
    %c0_87 = arith.constant 0 : index
    %c0_88 = arith.constant 0 : index
    %142 = vector.load %arg12[%c3_86, %c0_87, %c0_88] : memref<4x8x16xf32, #tpu.memory_space<vmem>>, vector<1x8x16xf32>
    %143 = vector.shape_cast %142 : vector<1x8x16xf32> to vector<8x16xf32>
    %144 = vector.shape_cast %141 : vector<8x16xf32> to vector<1x8x16xf32>
    tpu.vector_store %arg12[%c3_86, %c0_87, %c0_88], %144 {strides = array<i32>} : memref<4x8x16xf32, #tpu.memory_space<vmem>>, vector<1x8x16xf32>,
    %c3_89 = arith.constant 3 : index
    %c0_90 = arith.constant 0 : index
    %c0_91 = arith.constant 0 : index
    %145 = vector.load %arg10[%c3_89, %c0_90, %c0_91] : memref<4x8x1xf32, #tpu.memory_space<vmem>>, vector<1x8x1xf32>
    %146 = vector.shape_cast %145 : vector<1x8x1xf32> to vector<8x1xf32>
    %147 = vector.shape_cast %121 : vector<8x1xf32> to vector<1x8x1xf32>
    tpu.vector_store %arg10[%c3_89, %c0_90, %c0_91], %147 {strides = array<i32>} : memref<4x8x1xf32, #tpu.memory_space<vmem>>, vector<1x8x1xf32>,
    %c0_i32_92 = arith.constant 0 : i32
    %148 = arith.cmpi eq, %arg2, %c0_i32_92 : i32
    %149 = arith.extui %148 : i1 to i32
    %c0_i32_93 = arith.constant 0 : i32
    %150 = arith.cmpi ne, %149, %c0_i32_93 : i32
    scf.if %150 {
      %cst_94 = arith.constant 0.000000e+00 : f32
      %151 = vector.broadcast %cst_94 : f32 to vector<8x32xf32>
      %c0_95 = arith.constant 0 : index
      %c0_96 = arith.constant 0 : index
      %c0_97 = arith.constant 0 : index
      %152 = vector.load %arg12[%c0_95, %c0_96, %c0_97] : memref<4x8x16xf32, #tpu.memory_space<vmem>>, vector<1x8x16xf32>
      %153 = vector.shape_cast %152 : vector<1x8x16xf32> to vector<8x16xf32>
      %c0_98 = arith.constant 0 : index
      %c0_99 = arith.constant 0 : index
      %c0_100 = arith.constant 0 : index
      %154 = vector.load %arg11[%c0_98, %c0_99, %c0_100] : memref<4x8x1xf32, #tpu.memory_space<vmem>>, vector<1x8x1xf32>
      %155 = vector.shape_cast %154 : vector<1x8x1xf32> to vector<8x1xf32>
      %156 = tpu.reciprocal %155 {approx = true} : vector<8x1xf32> -> vector<8x1xf32>
      %157 = vector.broadcast %156 : vector<8x1xf32> to vector<8x16xf32>
      %158 = arith.mulf %153, %157 : vector<8x16xf32>
      %c0_101 = arith.constant 0 : index
      %c0_102 = arith.constant 0 : index
      %159 = vector.load %arg7[%c0_101, %c0_102] : memref<64x32xf32, #tpu.memory_space<vmem>>, vector<16x32xf32>
      %cst_103 = arith.constant dense<0.000000e+00> : vector<8x32xf32>
      %160 = tpu.matmul %158, %159, %cst_103 {dimension_numbers = #tpu.dot_dimension_numbers<[1], [0], [0], [1], [0, 0, 1, 1], [], []>} : vector<8x16xf32>, vector<16x32xf32>, vector<8x32xf32> -> vector<8x32xf32>
      %161 = arith.addf %151, %160 : vector<8x32xf32>
      %c1_104 = arith.constant 1 : index
      %c0_105 = arith.constant 0 : index
      %c0_106 = arith.constant 0 : index
      %162 = vector.load %arg12[%c1_104, %c0_105, %c0_106] : memref<4x8x16xf32, #tpu.memory_space<vmem>>, vector<1x8x16xf32>
      %163 = vector.shape_cast %162 : vector<1x8x16xf32> to vector<8x16xf32>
      %c1_107 = arith.constant 1 : index
      %c0_108 = arith.constant 0 : index
      %c0_109 = arith.constant 0 : index
      %164 = vector.load %arg11[%c1_107, %c0_108, %c0_109] : memref<4x8x1xf32, #tpu.memory_space<vmem>>, vector<1x8x1xf32>
      %165 = vector.shape_cast %164 : vector<1x8x1xf32> to vector<8x1xf32>
      %166 = tpu.reciprocal %165 {approx = true} : vector<8x1xf32> -> vector<8x1xf32>
      %167 = vector.broadcast %166 : vector<8x1xf32> to vector<8x16xf32>
      %168 = arith.mulf %163, %167 : vector<8x16xf32>
      %c16 = arith.constant 16 : index
      %c0_110 = arith.constant 0 : index
      %169 = vector.load %arg7[%c16, %c0_110] : memref<64x32xf32, #tpu.memory_space<vmem>>, vector<16x32xf32>
      %cst_111 = arith.constant dense<0.000000e+00> : vector<8x32xf32>
      %170 = tpu.matmul %168, %169, %cst_111 {dimension_numbers = #tpu.dot_dimension_numbers<[1], [0], [0], [1], [0, 0, 1, 1], [], []>} : vector<8x16xf32>, vector<16x32xf32>, vector<8x32xf32> -> vector<8x32xf32>
      %171 = arith.addf %161, %170 : vector<8x32xf32>
      %c2_112 = arith.constant 2 : index
      %c0_113 = arith.constant 0 : index
      %c0_114 = arith.constant 0 : index
      %172 = vector.load %arg12[%c2_112, %c0_113, %c0_114] : memref<4x8x16xf32, #tpu.memory_space<vmem>>, vector<1x8x16xf32>
      %173 = vector.shape_cast %172 : vector<1x8x16xf32> to vector<8x16xf32>
      %c2_115 = arith.constant 2 : index
      %c0_116 = arith.constant 0 : index
      %c0_117 = arith.constant 0 : index
      %174 = vector.load %arg11[%c2_115, %c0_116, %c0_117] : memref<4x8x1xf32, #tpu.memory_space<vmem>>, vector<1x8x1xf32>
      %175 = vector.shape_cast %174 : vector<1x8x1xf32> to vector<8x1xf32>
      %176 = tpu.reciprocal %175 {approx = true} : vector<8x1xf32> -> vector<8x1xf32>
      %177 = vector.broadcast %176 : vector<8x1xf32> to vector<8x16xf32>
      %178 = arith.mulf %173, %177 : vector<8x16xf32>
      %c32 = arith.constant 32 : index
      %c0_118 = arith.constant 0 : index
      %179 = vector.load %arg7[%c32, %c0_118] : memref<64x32xf32, #tpu.memory_space<vmem>>, vector<16x32xf32>
      %cst_119 = arith.constant dense<0.000000e+00> : vector<8x32xf32>
      %180 = tpu.matmul %178, %179, %cst_119 {dimension_numbers = #tpu.dot_dimension_numbers<[1], [0], [0], [1], [0, 0, 1, 1], [], []>} : vector<8x16xf32>, vector<16x32xf32>, vector<8x32xf32> -> vector<8x32xf32>
      %181 = arith.addf %171, %180 : vector<8x32xf32>
      %c3_120 = arith.constant 3 : index
      %c0_121 = arith.constant 0 : index
      %c0_122 = arith.constant 0 : index
      %182 = vector.load %arg12[%c3_120, %c0_121, %c0_122] : memref<4x8x16xf32, #tpu.memory_space<vmem>>, vector<1x8x16xf32>
      %183 = vector.shape_cast %182 : vector<1x8x16xf32> to vector<8x16xf32>
      %c3_123 = arith.constant 3 : index
      %c0_124 = arith.constant 0 : index
      %c0_125 = arith.constant 0 : index
      %184 = vector.load %arg11[%c3_123, %c0_124, %c0_125] : memref<4x8x1xf32, #tpu.memory_space<vmem>>, vector<1x8x1xf32>
      %185 = vector.shape_cast %184 : vector<1x8x1xf32> to vector<8x1xf32>
      %186 = tpu.reciprocal %185 {approx = true} : vector<8x1xf32> -> vector<8x1xf32>
      %187 = vector.broadcast %186 : vector<8x1xf32> to vector<8x16xf32>
      %188 = arith.mulf %183, %187 : vector<8x16xf32>
      %c48 = arith.constant 48 : index
      %c0_126 = arith.constant 0 : index
      %189 = vector.load %arg7[%c48, %c0_126] : memref<64x32xf32, #tpu.memory_space<vmem>>, vector<16x32xf32>
      %cst_127 = arith.constant dense<0.000000e+00> : vector<8x32xf32>
      %190 = tpu.matmul %188, %189, %cst_127 {dimension_numbers = #tpu.dot_dimension_numbers<[1], [0], [0], [1], [0, 0, 1, 1], [], []>} : vector<8x16xf32>, vector<16x32xf32>, vector<8x32xf32> -> vector<8x32xf32>
      %191 = arith.addf %181, %190 : vector<8x32xf32>
      %192 = vector.shape_cast %191 : vector<8x32xf32> to vector<1x8x32xf32>
      %c0_128 = arith.constant 0 : index
      %c0_129 = arith.constant 0 : index
      %c0_130 = arith.constant 0 : index
      %193 = vector.load %arg8[%c0_128, %c0_129, %c0_130] : memref<1x8x32xf32, #tpu.memory_space<vmem>>, vector<1x8x32xf32>
      tpu.vector_store %arg8[%c0_128, %c0_129, %c0_130], %192 {strides = array<i32>} : memref<1x8x32xf32, #tpu.memory_space<vmem>>, vector<1x8x32xf32>,
    } else {
    }
    return
  }
  func.func @transform_0(%arg0: i32, %arg1: i32, %arg2: i32) -> (i32, i32, i32) {
    %c0_i32 = arith.constant 0 : i32
    %c0_i32_0 = arith.constant 0 : i32
    return %arg0, %arg1, %c0_i32 : i32, i32, i32
  }
  func.func @transform_1(%arg0: i32, %arg1: i32, %arg2: i32) -> (i32, i32, i32) {
    %c0_i32 = arith.constant 0 : i32
    %c0_i32_0 = arith.constant 0 : i32
    return %arg0, %arg2, %c0_i32 : i32, i32, i32
  }
  func.func @transform_2(%arg0: i32, %arg1: i32, %arg2: i32) -> (i32, i32) {
    %c0_i32 = arith.constant 0 : i32
    %c0_i32_0 = arith.constant 0 : i32
    %c0_i32_1 = arith.constant 0 : i32
    return %c0_i32, %c0_i32_0 : i32, i32
  }
  func.func @transform_3(%arg0: i32, %arg1: i32, %arg2: i32) -> (i32, i32) {
    %c0_i32 = arith.constant 0 : i32
    %c0_i32_0 = arith.constant 0 : i32
    %c0_i32_1 = arith.constant 0 : i32
    return %c0_i32, %c0_i32_0 : i32, i32
  }
  func.func @transform_4(%arg0: i32, %arg1: i32, %arg2: i32) -> (i32, i32) {
    %c0_i32 = arith.constant 0 : i32
    %c0_i32_0 = arith.constant 0 : i32
    %c0_i32_1 = arith.constant 0 : i32
    return %c0_i32, %c0_i32_0 : i32, i32
  }
  func.func @transform_5(%arg0: i32, %arg1: i32, %arg2: i32) -> (i32, i32, i32) {
    %c0_i32 = arith.constant 0 : i32
    %c0_i32_0 = arith.constant 0 : i32
    return %arg0, %arg1, %c0_i32 : i32, i32, i32
  }
}

</mosaic_0001>

<bundles_post_ra>
// kernel: tpu_custom_call.1
= control target key start
LH: loop header
LB: loop body
LE: loop exit
PB: predicated region body
PF: predicated region fallthrough
CT: control target
= control target key end

     0   :  { %10 = vsyncpa [#allocation7], 0  ;;  %s2343_s0 = inlined_call_operand.vmem [shape: f32[2,8,32], index: 0, kind: input, shape index: {}]   ;;  %s2344_s1 = inlined_call_operand.vmem [shape: f32[2,8,32], index: 1, kind: input, shape index: {}]   ;;  %s2345_s2 = inlined_call_operand.vmem [shape: f32[32,64], index: 2, kind: input, shape index: {}]   ;;  %s2346_s3 = inlined_call_operand.vmem [shape: f32[32,128], index: 3, kind: input, shape index: {}]   ;;  %s2347_s4 = inlined_call_operand.vmem [shape: f32[64,32], index: 4, kind: input, shape index: {}]   ;;  %s2348_s5 = inlined_call_operand.hbm [shape: f32[2,8,32], index: 5, kind: output, shape index: {}]  }
   0x1   :  { %12 = vsyncpa [#allocation7 + $0x1], 0  ;;  %s2033_s18 = smov 0   ;;  %s2035_s19 = smov 0  }
   0x2   :  { %s2037_s20 = smov 0   ;;  %s2039_s21 = smov 0  }
   0x3   :  { %s2041_s22 = smov 0   ;;  %s2043_s23 = smov 0  }
   0x4 LB: > { %s1663_s24 = sadd.s32 4294967295, %s1989_s23   ;;  %s1664_s25 = sadd.s32 4294967294, %s1989_s23   ;;  %s1989_s23 = sphi %s2043_s23, %s18_s23   ;;  %s1985_s22 = sphi %s2041_s22, %s2355_s22   ;;  %s1981_s21 = sphi %s2039_s21, %s2354_s21   ;;  %s1977_s20 = sphi %s2037_s20, %s2353_s20   ;;  %s1973_s19 = sphi %s2035_s19, %s2352_s19   ;;  %s1969_s18 = sphi %s2033_s18, %s2351_s18  }
   0x5   : > { %s37_s26 = sadd.s32 1, %s1985_s22  ;;  %s165_s27 = sadd.s32 1, %s1977_s20 }
   0x6   : > { %p39_p0 = scmp.ge.s32.totalorder %s37_s26, 2  ;;  %p175_p1 = scmp.ne.s32.totalorder %s1977_s20, %s1973_s19 }
   0x7   : > { %p176_p2 = scmp.eq.s32.totalorder %s1663_s24, 1  ;;  %p181_p3 = scmp.ne.s32.totalorder %s1973_s19, %s1969_s18 }
   0x8   : > { %s2357_s26 = smov (%p39_p0, %s37_s26), 0  ;;  %p182_p5 = scmp.eq.s32.totalorder %s1664_s25, 1 }
   0x9   : > { %p2073_p4 = por %p176_p2, %p175_p1  ;;  %s160_s29 = ssub.s32 %s1985_s22, %s2357_s26 }
   0xa   : > { %p1667_p6 = scmp.ge.s32.totalorder %s1989_s23, 1  ;;  %p163_p7 = scmp.eq.s32.totalorder %s160_s29, 0 }
   0xb   : > { %p2080_p8 = por %p182_p5, %p181_p3  ;;  %p229_p9 = scmp.lt.s32.totalorder %s1989_s23, 3 }
   0xc   : > { %s2086_s6 = scalar_select %p163_p7, %s1977_s20, %s165_s27  }
   0xd   : > { %p230_p10 = pnand %p1667_p6, %p229_p9 }
   0xe   : > { %p266_p11 = scmp.lt.s32.totalorder (!%p230_p10), %s1981_s21, 1  ;;  %s1993_s16 = smov (!%p230_p10), 96  }
   0xf   : > { %233 = sbr.rel (%p230_p10) target bundleno = 1326 (0x52e), region = 40  ;;  %s1994_s17 = smov (!%p230_p10), 112  }
  0x10   : > { %s1995_s24 = smov (!%p230_p10), 80   ;;  %s1998_s25 = smov (!%p230_p10), 64  }
  0x11   : > { %s2000_s29 = smov (!%p230_p10), 32   ;;  %s2001_s7 = smov (!%p230_p10), 16  }
  0x12   : > { %s263_s9 = sand.u32 (!%p230_p10), 1, %s1973_s19   ;;  %s1690_s11 = sshll.u32 (!%p230_p10), %s1981_s21, 7 }
  0x14   : > { %v288_v0 = vld [vmem:[%s2345_s2 + $0x18] sm:$0xff]  ;;  %v1991_v2 = vmov 0.0   ;;  %v287_v3 = vld [vmem:[%s2345_s2 + $0x10] sm:$0xff]  ;;  %s267_s15 = scalar_select %p266_p11, %s1981_s21, 1  ;;  %v286_v5 = vld [vmem:[%s2345_s2 + $0x8] sm:$0xff]  ;;  %vm1992_vm0 = vmmov 0  }
  0x15   : > { %v383_v1 = vld [vmem:[%s2346_s3 + $0x18] sm:$0xff]  ;;  %1731 = vmatprep.subr.mxu0 %v1991_v2  ;;  %1742 = vmatprep.subr.mxu1 %v1991_v2  ;;  %v382_v4 = vld [vmem:[%s2346_s3 + $0x10] sm:$0xff]  ;;  %v381_v6 = vld [vmem:[%s2346_s3 + $0x8] sm:$0xff]  ;;  %vm289_vm1 = vcmask 261120   ;;  %vm374_vm2 = vcmask 130048   ;;  %vm363_vm3 = vcmask 523264  }
  0x16   : > { %1732 = vmatpush3.msra.mxu0 %v288_v0  ;;  %1743 = vmatpush3.msra.mxu1 %v383_v1  ;;  %s1669_s27 = sshll.u32 %s267_s15, 3  ;;  %v285_v7 = vld [vmem:[%s2345_s2] sm:$0xff]  ;;  %375 = vst.msk [vmem:[#allocation5] sm:$0xff] %vm374_vm2, %v1991_v2  ;;  %376 = vst.msk [vmem:[#allocation5 + $0x8] sm:$0xff] %vm374_vm2, %v1991_v2  ;;  %vm365_vm4 = vcmask 7168   ;;  %v1996_v22 = vmov -inf  }
  0x17   : > { %1733 = vmatprep.subr.mxu0 %v1991_v2  ;;  %1744 = vmatprep.subr.mxu1 %v1991_v2  ;;  %s272_s10 = scalar_lea.vmem %s2343_s0, %s1669_s27  ;;  %s279_s13 = scalar_lea.vmem %s2344_s1, %s1669_s27  ;;  %v380_v9 = vld [vmem:[%s2346_s3] sm:$0xff]  ;;  %377 = vst.msk [vmem:[#allocation5 + $0x10] sm:$0xff] %vm374_vm2, %v1991_v2  ;;  %378 = vst.msk [vmem:[#allocation5 + $0x18] sm:$0xff] %vm374_vm2, %v1991_v2  ;;  %vm537_vm5 = vcmask 64512   ;;  %v1997_v26 = vmov 0  }
  0x18   : > { %1734 = vmatpush3.msra.mxu0 %v287_v3  ;;  %1745 = vmatpush3.msra.mxu1 %v382_v4  ;;  %v284_v8 = vld [vmem:[%s272_s10] sm:$0xff]  ;;  %366 = vst.msk [vmem:[#allocation3] sm:$0xff] %vm365_vm4, %v1996_v22  ;;  %367 = vst.msk [vmem:[#allocation3 + $0x8] sm:$0xff] %vm365_vm4, %v1996_v22  ;;  %s1999_s27 = smov 48   ;;  %s1668_s10 = sshll.u32 %s263_s9, 3 }
  0x19   : > { %1735 = vmatprep.subr.mxu0 %v1991_v2  ;;  %1746 = vmatprep.subr.mxu1 %v1991_v2  ;;  %v379_v10 = vld [vmem:[%s279_s13] sm:$0xff]  ;;  %368 = vst.msk [vmem:[#allocation3 + $0x10] sm:$0xff] %vm365_vm4, %v1996_v22  ;;  %369 = vst.msk [vmem:[#allocation3 + $0x18] sm:$0xff] %vm365_vm4, %v1996_v22  ;;  %s265_s12 = scalar_lea.vmem [#allocation6], %s1668_s10  ;;  %s2002_s21 = smov [#allocation6]  }
  0x1a   : > { %1736 = vmatpush3.msra.mxu0 %v286_v5  ;;  %1739 = vmatprep.mubr.msk.f32.mxu0 %vm1992_vm0, %v1991_v2  ;;  %370 = vst.msk [vmem:[#allocation4] sm:$0xff] %vm365_vm4, %v1991_v2  ;;  %371 = vst.msk [vmem:[#allocation4 + $0x8] sm:$0xff] %vm365_vm4, %v1991_v2  ;;  %s1574_s13 = sshll.u32 %s265_s12, 4  ;;  %s1575_s13 = int_to_ptr.vmem [resolvable:$true] %s1574_s13 }
  0x1b   : > { %1737 = vmatprep.subr.mxu0 %v1991_v2  ;;  %1747 = vmatpush3.msra.mxu1 %v381_v6  ;;  %372 = vst.msk [vmem:[#allocation4 + $0x10] sm:$0xff] %vm365_vm4, %v1991_v2  ;;  %373 = vst.msk [vmem:[#allocation4 + $0x18] sm:$0xff] %vm365_vm4, %v1991_v2 }
  0x1c   : > { %1738 = vmatpush3.msra.mxu0 %v285_v7  ;;  %1748 = vmatprep.subr.mxu1 %v1991_v2 }
  0x1d   : > { %1740 = vmatmul.mubr.msk.f32.vlgmr.msra.gmra.mxu0 %vm289_vm1, %v284_v8  ;;  %1749 = vmatpush3.msra.mxu1 %v380_v9 }
  0x1e   : > { %1750 = vmatprep.mubr.msk.f32.mxu1 %vm1992_vm0, %v1991_v2  ;;  %1753 = vmatprep.subr.mxu0 %v1991_v2 }
  0x1f   : > { %1751 = vmatmul.mubr.msk.f32.vlgmr.msra.gmra.mxu1 %vm289_vm1, %v379_v10  ;;  %1755 = vmatprep.mubr.msk.f32.mxu0 %vm1992_vm0, %v1991_v2  ;;  %v2190_v36 = vld [vmem:[#allocation3] sm:$0xff]  ;;  %v726_v40 = vld [vmem:[#allocation3 + $0x8] sm:$0xff] }
  0x20   : > { %1758 = vmatprep.subr.mxu1 %v1991_v2  ;;  %1760 = vmatprep.mubr.msk.f32.mxu1 %vm1992_vm0, %v1991_v2  ;;  %v2200_v43 = vld [vmem:[#allocation3 + $0x10] sm:$0xff]  ;;  %v2206_v47 = vld [vmem:[#allocation3 + $0x18] sm:$0xff] }
  0x21   : > { %1887 = vset.pattern.permute.xlu1 %v1997_v26  ;;  %1888 = vset.pattern.permute.xlu0 %v1997_v26 }
  0xdd   : > { %v359_v11 = vpop.f32.mrf.mxu0 }
  0xde   : > { %364 = vst.msk [vmem:[#allocation2] sm:$0xff] %vm363_vm3, %v359_v11 }
  0xdf   : > { %v1741_v12 = vpop.f32.mrf.mxu0  ;;  %v2148_v13 = vpop.f32.mrf.mxu1 }
  0xe0   : > { %839 = vrot.lane.b32.xlu1 %v2148_v13, %s1993_s16  ;;  %649 = vrot.lane.b32.xlu0 %v2148_v13, %s1994_s17 }
  0xe1   : > { %v1752_v14 = vpop.f32.mrf.mxu1  ;;  %1754 = vmatpush3.xpose.msk.msra.mxu0 %vm374_vm2, %v2148_v13 }
  0xe2   : > { %1763 = vmatprep.subr.mxu0 %v1991_v2 }
  0xe5   : > { %v458_v15 = vld [vmem:[#allocation2] sm:$0xff] }
  0xe6   : > { %837 = vrot.lane.b32.xlu1 %v458_v15, %s1993_s16  ;;  %647 = vrot.lane.b32.xlu0 %v458_v15, %s1994_s17  ;;  %s2302_s16 = scalar_lea.hbm %s2348_s5, %s1690_s11  ;;  %s1560_s17 = scalar_lea.sflag [#allocation7], %s263_s9 }
  0xe7   : > { %1756 = vmatmul.mubr.msk.f32.vlgmr.msra.gmra.mxu0 %vm374_vm2, %v458_v15 }
  0xe8   : > { %1765 = vmatprep.mubr.msk.f32.mxu0 %vm1992_vm0, %v1991_v2 }
  0xea   : > { %1027 = vrot.lane.b32.xlu1 %v458_v15, %s1995_s24  ;;  %1029 = vrot.lane.b32.xlu0 %v2148_v13, %s1995_s24  ;;  %s1913_s24 = scalar_lea.vmem %s1575_s13, 128 }
  0xeb   : > { %p1914_p12 = scmp.ne.s32.totalorder %s1575_s13, %s1913_s24 }
  0xed   : > { %p1915_p13 = pnand %p1914_p12, %p2073_p4 }
  0xef   : > { %p1916_p0 = pneg %p1915_p13 }
 0x152   : > { %v650_v16 = vpop.permute.xlu0 %649  ;;  %v840_v17 = vpop.permute.xlu1 %839 }
 0x153   : > { %1764 = vmatpush3.xpose.msk.msra.mxu0 %vm374_vm2, %v650_v16 }
 0x154   : > { %1773 = vmatprep.subr.mxu0 %v1991_v2 }
 0x158   : > { %v648_v18 = vpop.permute.xlu0 %647  ;;  %v838_v19 = vpop.permute.xlu1 %837 }
 0x159   : > { %1766 = vmatmul.mubr.msk.f32.vlgmr.msra.gmra.mxu0 %vm374_vm2, %v648_v18 }
 0x15a   : > { %1774 = vmatpush3.xpose.msk.msra.mxu0 %vm374_vm2, %v840_v17  ;;  %1775 = vmatprep.mubr.msk.f32.mxu0 %vm1992_vm0, %v1991_v2 }
 0x15b   : > { %1783 = vmatprep.subr.mxu0 %v1991_v2 }
 0x15c   : > { %v1030_v20 = vpop.permute.xlu0 %1029  ;;  %v1028_v21 = vpop.permute.xlu1 %1027 }
 0x15d   : > { %1776 = vmatmul.mubr.msk.f32.vlgmr.msra.gmra.mxu0 %vm374_vm2, %v838_v19  ;;  %v553_v19 = vld [vmem:[#allocation4] sm:$0xff] }
 0x15e   : > { %1784 = vmatpush3.xpose.msk.msra.mxu0 %vm374_vm2, %v1030_v20  ;;  %1785 = vmatprep.mubr.msk.f32.mxu0 %vm1992_vm0, %v1991_v2 }
 0x15f   : > { %1793 = vmatprep.subr.mxu0 %v1991_v2 }
 0x161   : > { %1786 = vmatmul.mubr.msk.f32.vlgmr.msra.gmra.mxu0 %vm374_vm2, %v1028_v21 }
 0x162   : > { %1797 = vmatprep.mubr.msk.f32.mxu0 %vm1992_vm0, %v1991_v2 }
 0x1a7   : > { %v532_v23 = vpop.f32.mrf.mxu0 }
 0x1a8   : > { %v538_v24 = vsel %vm537_vm5, %v532_v23, -inf }
 0x1a9   : > { %539 = vmax.xlane.f32.xlu0 %v538_v24  ;;  %v1757_v25 = vpop.f32.mrf.mxu0 }
 0x219   : > { %v721_v27 = vpop.f32.mrf.mxu0 }
 0x21a   : > { %v727_v28 = vsel %vm537_vm5, %v721_v27, -inf }
 0x21b   : > { %728 = vmax.xlane.f32.xlu1 %v727_v28  ;;  %v1767_v29 = vpop.f32.mrf.mxu0  ;;  %v1229_v28 = vld [vmem:[%s2347_s4] sm:$0xff] }
 0x21c   : > { %v1241_v29 = vld [vmem:[%s2347_s4 + $0x18] sm:$0xff] }
 0x21d   : > { %v911_v30 = vpop.f32.mrf.mxu0  ;;  %1794 = vmatpush3.msra.mxu0 %v1241_v29 }
 0x21e   : > { %v917_v31 = vsel %vm537_vm5, %v911_v30, -inf  ;;  %1795 = vmatprep.subr.mxu0 %v1991_v2 }
 0x21f   : > { %918 = vmax.xlane.f32.xlu0 %v917_v31  ;;  %v1777_v32 = vpop.f32.mrf.mxu0 }
 0x221   : > { %v1101_v33 = vpop.f32.mrf.mxu0 }
 0x222   : > { %v1107_v34 = vsel %vm537_vm5, %v1101_v33, -inf }
 0x223   : > { %1108 = vmax.xlane.f32.xlu0 %v1107_v34  ;;  %v1787_v35 = vpop.f32.mrf.mxu0 }
 0x232   : > { %v540_v37 = vpop.xlane.xlu0 %539 }
 0x233   : > { %v2193_v38 = vmax.f32 %v2190_v36, %v540_v37  ;;  %v1123_v37 = vld [vmem:[#allocation4 + $0x18] sm:$0xff] }
 0x235   : > { %v542_v39 = vsub.f32 %v2190_v36, %v2193_v38  ;;  %646 = vst.msk [vmem:[#allocation3] sm:$0xff] %vm365_vm4, %v2193_v38  ;;  %547 = vperm.xlu1 %1887, %v2193_v38  }
 0x237   : > { %v543_v11 = vmul.f32 1.442695, %v542_v39 }
 0x2a4   : > { %v729_v41 = vpop.xlane.xlu1 %728 }
 0x2a5   : > { %v730_v42 = vmax.f32 %v726_v40, %v729_v41 }
 0x2a7   : > { %v731_v44 = vsub.f32 %v726_v40, %v730_v42  ;;  %836 = vst.msk [vmem:[#allocation3 + $0x8] sm:$0xff] %vm365_vm4, %v730_v42  ;;  %736 = vperm.xlu0 %1888, %v730_v42  }
 0x2a8   : > { %v919_v45 = vpop.xlane.xlu0 %918 }
 0x2a9   : > { %v2204_v46 = vmax.f32 %v2200_v43, %v919_v45  ;;  %v732_v9 = vmul.f32 1.442695, %v731_v44  ;;  %v1240_v45 = vld [vmem:[%s2347_s4 + $0x10] sm:$0xff] }
 0x2aa   : > { %1796 = vmatpush3.msra.mxu0 %v1240_v45 }
 0x2ab   : > { %v921_v48 = vsub.f32 %v2200_v43, %v2204_v46  ;;  %1026 = vst.msk [vmem:[#allocation3 + $0x10] sm:$0xff] %vm365_vm4, %v2204_v46  ;;  %926 = vperm.xlu1 %1887, %v2204_v46   ;;  %1807 = vmatprep.subr.mxu0 %v1991_v2 }
 0x2ac   : > { %v1109_v49 = vpop.xlane.xlu0 %1108 }
 0x2ad   : > { %v2214_v50 = vmax.f32 %v2206_v47, %v1109_v49  ;;  %v922_v14 = vmul.f32 1.442695, %v921_v48 }
 0x2af   : > { %v1111_v51 = vsub.f32 %v2206_v47, %v2214_v50  ;;  %1216 = vst.msk [vmem:[#allocation3 + $0x18] sm:$0xff] %vm365_vm4, %v2214_v50  ;;  %1116 = vperm.xlu1 %1887, %v2214_v50   ;;  %v561_v50 = vld [vmem:[#allocation5] sm:$0xff] }
 0x2b0   : > { %v548_v52 = vpop.permute.xlu1 %547 }
 0x2b1   : > { %v550_v53 = vsub.f32 %v532_v23, %v548_v52  ;;  %v1112_v16 = vmul.f32 1.442695, %v1111_v51 }
 0x2b3   : > { %v551_v54 = vmul.f32 1.442695, %v550_v53  ;;  %568 = vrot.lane.b32.xlu1 %v2148_v13, %s1998_s25  ;;  %s1917_s25 = sshll.u32 %s2002_s21, 4  ;;  %s1918_s25 = int_to_ptr.vmem [resolvable:$false] %s1917_s25 }
 0x2b4   : > { %p1920_p1 = scmp.lt.s32.totalorder %s1575_s13, %s1918_s25 }
 0x2b5   : > { %1889 = vpow2.f32 %v551_v54 }
 0x2b7   : > { %758 = vrot.lane.b32.xlu1 %v2148_v13, %s1999_s27  ;;  %s1919_s27 = scalar_lea.vmem %s1918_s25, 256 }
 0x2b8   : > { %p1921_p2 = scmp.lt.s32.totalorder %s1919_s27, %s1913_s24 }
 0x2ba   : > { %p1922_p3 = por %p1921_p2, %p1920_p1 }
 0x2bb   : > { %948 = vrot.lane.b32.xlu1 %v2148_v13, %s2000_s29 }
 0x2bc   : > { %p1923_p5 = pnand %p1922_p3, %p1916_p0 }
 0x2bf   : > { %1138 = vrot.lane.b32.xlu1 %v2148_v13, %s2001_s7 }
 0x2c2   : > { %v1890_v55 = vpop.eup %1889 }
 0x2c3   : > { %v555_v56 = vsel %vm537_vm5, %v1890_v55, 0.0 }
 0x2c6   : > { %556 = vadd.xlane.f32.xlu0 %v555_v56 }
 0x322   : > { %v737_v57 = vpop.permute.xlu0 %736 }
 0x323   : > { %v739_v58 = vsub.f32 %v721_v27, %v737_v57  ;;  %v1230_v27 = vld [vmem:[%s2347_s4 + $0x8] sm:$0xff] }
 0x325   : > { %v740_v59 = vmul.f32 1.442695, %v739_v58 }
 0x326   : > { %v927_v60 = vpop.permute.xlu1 %926 }
 0x327   : > { %1891 = vpow2.f32 %v740_v59  ;;  %v929_v61 = vsub.f32 %v911_v30, %v927_v60  ;;  %v743_v30 = vld [vmem:[#allocation4 + $0x8] sm:$0xff]  ;;  %v941_v59 = vld [vmem:[#allocation5 + $0x10] sm:$0xff] }
 0x329   : > { %v930_v62 = vmul.f32 1.442695, %v929_v61 }
 0x32a   : > { %v1117_v63 = vpop.permute.xlu1 %1116 }
 0x32b   : > { %1893 = vpow2.f32 %v930_v62  ;;  %v1119_v0 = vsub.f32 %v1101_v33, %v1117_v63  ;;  %v933_v33 = vld [vmem:[#allocation4 + $0x10] sm:$0xff] }
 0x32d   : > { %v1120_v1 = vmul.f32 1.442695, %v1119_v0 }
 0x32e   : > { %v569_v3 = vpop.permute.xlu1 %568 }
 0x32f   : > { %1895 = vpow2.f32 %v1120_v1  ;;  %1759 = vmatpush3.msra.mxu1 %v569_v3  ;;  %v1131_v1 = vld [vmem:[#allocation5 + $0x18] sm:$0xff] }
 0x330   : > { %1761 = vmatmul.mubr.msk.f32.vlgmr.msra.gmra.mxu1 %vm537_vm5, %v1890_v55  ;;  %1768 = vmatprep.subr.mxu1 %v1991_v2  ;;  %1897 = vpow2.f32 %v732_v9  ;;  %v751_v55 = vld [vmem:[#allocation5 + $0x8] sm:$0xff]  ;;  %v1483_v9 = vld [vmem:[%s2347_s4 + $0x38] sm:$0xff] }
 0x331   : > { %1770 = vmatprep.mubr.msk.f32.mxu1 %vm1992_vm0, %v1991_v2  ;;  %1899 = vpow2.f32 %v543_v11 }
 0x332   : > { %v759_v4 = vpop.permute.xlu1 %758  ;;  %1901 = vpow2.f32 %v922_v14 }
 0x333   : > { %1769 = vmatpush3.msra.mxu1 %v759_v4  ;;  %1903 = vpow2.f32 %v1112_v16 }
 0x334   : > { %v1892_v5 = vpop.eup %1891  ;;  %1778 = vmatprep.subr.mxu1 %v1991_v2 }
 0x335   : > { %1771 = vmatmul.mubr.msk.f32.vlgmr.msra.gmra.mxu1 %vm537_vm5, %v1892_v5  ;;  %v745_v6 = vsel %vm537_vm5, %v1892_v5, 0.0 }
 0x336   : > { %v949_v7 = vpop.permute.xlu1 %948  ;;  %746 = vadd.xlane.f32.xlu1 %v745_v6  ;;  %1780 = vmatprep.mubr.msk.f32.mxu1 %vm1992_vm0, %v1991_v2 }
 0x337   : > { %1779 = vmatpush3.msra.mxu1 %v949_v7 }
 0x338   : > { %v1894_v8 = vpop.eup %1893  ;;  %1788 = vmatprep.subr.mxu1 %v1991_v2 }
 0x339   : > { %1781 = vmatmul.mubr.msk.f32.vlgmr.msra.gmra.mxu1 %vm537_vm5, %v1894_v8  ;;  %v935_v10 = vsel %vm537_vm5, %v1894_v8, 0.0 }
 0x33a   : > { %v1139_v12 = vpop.permute.xlu1 %1138  ;;  %936 = vadd.xlane.f32.xlu1 %v935_v10  ;;  %1790 = vmatprep.mubr.msk.f32.mxu1 %vm1992_vm0, %v1991_v2 }
 0x33b   : > { %1789 = vmatpush3.msra.mxu1 %v1139_v12  ;;  %v1482_v12 = vld [vmem:[%s2347_s4 + $0x30] sm:$0xff] }
 0x33c   : > { %v1896_v13 = vpop.eup %1895  ;;  %1800 = vmatprep.subr.mxu1 %v1991_v2 }
 0x33d   : > { %1791 = vmatmul.mubr.msk.f32.vlgmr.msra.gmra.mxu1 %vm537_vm5, %v1896_v13  ;;  %v1125_v15 = vsel %vm537_vm5, %v1896_v13, 0.0  ;;  %v1898_v17 = vpop.eup %1897 }
 0x33e   : > { %1126 = vadd.xlane.f32.xlu0 %v1125_v15  ;;  %1804 = vmatprep.mubr.msk.f32.mxu1 %vm1992_vm0, %v1991_v2  ;;  %v1900_v18 = vpop.eup %1899  ;;  %v744_v31 = vmul.f32 %v1898_v17, %v743_v30 }
 0x33f   : > { %v1902_v20 = vpop.eup %1901  ;;  %v554_v21 = vmul.f32 %v1900_v18, %v553_v19  ;;  %1801 = vmatpush3.msra.mxu1 %v1230_v27  ;;  %v1397_v19 = vld [vmem:[%s2347_s4 + $0x20] sm:$0xff] }
 0x340   : > { %v1904_v24 = vpop.eup %1903  ;;  %1802 = vmatprep.subr.mxu1 %v1991_v2  ;;  %v934_v35 = vmul.f32 %v1902_v20, %v933_v33 }
 0x341   : > { %1803 = vmatpush3.msra.mxu1 %v1229_v28  ;;  %v1124_v39 = vmul.f32 %v1904_v24, %v1123_v37 }
 0x342   : > { %1814 = vmatprep.subr.mxu1 %v1991_v2 }
 0x34b   : > { %754 = vperm.xlu1 %1887, %v1898_v17  }
 0x34f   : > { %944 = vperm.xlu1 %1887, %v1902_v20   ;;  %v557_v22 = vpop.xlane.xlu0 %556 }
 0x350   : > { %v558_v23 = vadd.f32 %v557_v22, %v554_v21 }
 0x352   : > { %560 = vst.msk [vmem:[#allocation4] sm:$0xff] %vm365_vm4, %v558_v23 }
 0x353   : > { %1134 = vperm.xlu1 %1887, %v1904_v24  }
 0x354   : > { %564 = vperm.xlu0 %1888, %v1900_v18   ;;  %v1398_v18 = vld [vmem:[%s2347_s4 + $0x28] sm:$0xff] }
 0x359   : > { %v1221_v25 = vld [vmem:[#allocation4] sm:$0xff] }
 0x35a   : > { %1905 = vrcp.f32 %v1221_v25 }
 0x367   : > { %v1906_v26 = vpop.eup %1905 }
 0x368   : > { %1225 = vperm.xlu1 %1887, %v1906_v26  }
 0x3bf   : > { %v747_v32 = vpop.xlane.xlu1 %746 }
 0x3c0   : > { %v748_v34 = vadd.f32 %v747_v32, %v744_v31 }
 0x3c2   : > { %749 = vst.msk [vmem:[#allocation4 + $0x8] sm:$0xff] %vm365_vm4, %v748_v34 }
 0x3c3   : > { %v937_v36 = vpop.xlane.xlu1 %936 }
 0x3c4   : > { %v938_v38 = vadd.f32 %v937_v36, %v934_v35 }
 0x3c6   : > { %939 = vst.msk [vmem:[#allocation4 + $0x10] sm:$0xff] %vm365_vm4, %v938_v38 }
 0x3c7   : > { %v1127_v40 = vpop.xlane.xlu0 %1126  ;;  %v755_v49 = vpop.permute.xlu1 %754 }
 0x3c8   : > { %v1128_v41 = vadd.f32 %v1127_v40, %v1124_v39  ;;  %v757_v58 = vmul.f32 %v755_v49, %v751_v55 }
 0x3c9   : > { %v1232_v42 = vld [vmem:[#allocation4 + $0x8] sm:$0xff] }
 0x3ca   : > { %1129 = vst.msk [vmem:[#allocation4 + $0x18] sm:$0xff] %vm365_vm4, %v1128_v41  ;;  %1907 = vrcp.f32 %v1232_v42 }
 0x3cb   : > { %v945_v53 = vpop.permute.xlu1 %944 }
 0x3cc   : > { %v947_v0 = vmul.f32 %v945_v53, %v941_v59 }
 0x3cd   : > { %v1389_v43 = vld [vmem:[#allocation4 + $0x10] sm:$0xff] }
 0x3ce   : > { %1909 = vrcp.f32 %v1389_v43 }
 0x3cf   : > { %v565_v51 = vpop.permute.xlu0 %564  ;;  %v1135_v61 = vpop.permute.xlu1 %1134 }
 0x3d0   : > { %v567_v52 = vmul.f32 %v565_v51, %v561_v50  ;;  %v1137_v10 = vmul.f32 %v1135_v61, %v1131_v1 }
 0x3d1   : > { %v1474_v44 = vld [vmem:[#allocation4 + $0x18] sm:$0xff] }
 0x3d2   : > { %1911 = vrcp.f32 %v1474_v44 }
 0x3d7   : > { %v1908_v46 = vpop.eup %1907 }
 0x3d8   : > { %1236 = vperm.xlu0 %1888, %v1908_v46  }
 0x3db   : > { %v1910_v47 = vpop.eup %1909 }
 0x3dc   : > { %1393 = vperm.xlu0 %1888, %v1910_v47  }
 0x3df   : > { %v1912_v48 = vpop.eup %1911 }
 0x3e0   : > { %1478 = vperm.xlu1 %1887, %v1912_v48  }
 0x3e3   : > { %v1226_v4 = vpop.permute.xlu1 %1225 }
 0x3f0   : > { %v640_v54 = vpop.f32.mrf.mxu1 }
 0x3f1   : > { %v644_v56 = vadd.f32 %v640_v54, %v567_v52 }
 0x3f2   : > { %v1762_v57 = vpop.f32.mrf.mxu1 }
 0x3f3   : > { %645 = vst.msk [vmem:[#allocation5] sm:$0xff] %vm374_vm2, %v644_v56 }
 0x3f5   : > { %v830_v60 = vpop.f32.mrf.mxu1 }
 0x3f6   : > { %v834_v62 = vadd.f32 %v830_v60, %v757_v58 }
 0x3f7   : > { %v1772_v63 = vpop.f32.mrf.mxu1 }
 0x3f8   : > { %835 = vst.msk [vmem:[#allocation5 + $0x8] sm:$0xff] %vm374_vm2, %v834_v62 }
 0x3f9   : > { %v1020_v3 = vpop.f32.mrf.mxu1 }
 0x3fa   : > { %v1024_v5 = vadd.f32 %v1020_v3, %v947_v0  ;;  %v1220_v6 = vld [vmem:[#allocation5] sm:$0xff] }
 0x3fb   : > { %v1782_v7 = vpop.f32.mrf.mxu1  ;;  %v1228_v8 = vmul.f32 %v1226_v4, %v1220_v6 }
 0x3fc   : > { %1025 = vst.msk [vmem:[#allocation5 + $0x10] sm:$0xff] %vm374_vm2, %v1024_v5 }
 0x3fd   : > { %v1210_v11 = vpop.f32.mrf.mxu1  ;;  %1805 = vmatmul.mubr.msk.f32.vlgmr.msra.gmra.mxu1 %vm374_vm2, %v1228_v8 }
 0x3fe   : > { %v1214_v13 = vadd.f32 %v1210_v11, %v1137_v10  ;;  %1815 = vmatpush3.msra.mxu1 %v1483_v9  ;;  %1818 = vmatprep.mubr.msk.f32.mxu1 %vm1992_vm0, %v1991_v2 }
 0x3ff   : > { %v1792_v14 = vpop.f32.mrf.mxu1  ;;  %1816 = vmatprep.subr.mxu1 %v1991_v2  ;;  %v1231_v15 = vld [vmem:[#allocation5 + $0x8] sm:$0xff] }
 0x400   : > { %1215 = vst.msk [vmem:[#allocation5 + $0x18] sm:$0xff] %vm374_vm2, %v1214_v13  ;;  %1817 = vmatpush3.msra.mxu1 %v1482_v12 }
 0x403   : > { %v1388_v20 = vld [vmem:[#allocation5 + $0x10] sm:$0xff] }
 0x407   : > { %v1473_v23 = vld [vmem:[#allocation5 + $0x18] sm:$0xff] }
 0x453   : > { %v1237_v16 = vpop.permute.xlu0 %1236 }
 0x454   : > { %v1239_v17 = vmul.f32 %v1237_v16, %v1231_v15 }
 0x456   : > { %1798 = vmatmul.mubr.msk.f32.vlgmr.msra.gmra.mxu0 %vm374_vm2, %v1239_v17 }
 0x457   : > { %1808 = vmatpush3.msra.mxu0 %v1398_v18  ;;  %v1394_v21 = vpop.permute.xlu0 %1393  ;;  %1811 = vmatprep.mubr.msk.f32.mxu0 %vm1992_vm0, %v1991_v2 }
 0x458   : > { %v1396_v22 = vmul.f32 %v1394_v21, %v1388_v20  ;;  %1809 = vmatprep.subr.mxu0 %v1991_v2 }
 0x459   : > { %1810 = vmatpush3.msra.mxu0 %v1397_v19 }
 0x45a   : > { %1812 = vmatmul.mubr.msk.f32.vlgmr.msra.gmra.mxu0 %vm374_vm2, %v1396_v22 }
 0x45b   : > { %v1479_v24 = vpop.permute.xlu1 %1478 }
 0x45c   : > { %v1481_v25 = vmul.f32 %v1479_v24, %v1473_v23 }
 0x45e   : > { %1819 = vmatmul.mubr.msk.f32.vlgmr.msra.gmra.mxu1 %vm374_vm2, %v1481_v25 }
 0x4bd   : > { %v1384_v26 = vpop.f32.mrf.mxu1 }
 0x4bf   : > { %v1806_v27 = vpop.f32.mrf.mxu1 }
 0x516   : > { %v1311_v28 = vpop.f32.mrf.mxu0 }
 0x517   : > { %v1385_v31 = vadd.f32 %v1384_v26, %v1311_v28 }
 0x518   : > { %v1799_v29 = vpop.f32.mrf.mxu0 }
 0x51a   : > { %v1468_v30 = vpop.f32.mrf.mxu0 }
 0x51b   : > { %v1472_v2 = vadd.f32 %v1468_v30, %v1385_v31 }
 0x51c   : > { %v1813_v32 = vpop.f32.mrf.mxu0 }
 0x51e   : > { %v1553_v33 = vpop.f32.mrf.mxu1 }
 0x51f   : > { %v1557_v34 = vadd.f32 %v1553_v33, %v1472_v2 }
 0x520   : > { %v1820_v35 = vpop.f32.mrf.mxu1 }
 0x521   : > { %1558 = vst.msk [vmem:[%s265_s12] sm:$0xff] %vm289_vm1, %v1557_v34 }
 0x522   : > { %1926 = shalt.err (!%p1923_p5)
}
 0x523   : > { %s1927_s29 = scalar_lea.hbm %s2302_s16, 128  ;;  %s1931_s9 = scalar_lea.hbm %s2348_s5, 256 }
 0x524   : > { %p1928_p6 = scmp.ne.s32.totalorder %s2302_s16, %s1927_s29  ;;  %p1932_p10 = scmp.lt.s32.totalorder %s2302_s16, %s2348_s5 }
 0x525   : > { %p1933_p11 = scmp.lt.s32.totalorder %s1931_s9, %s1927_s29 }
 0x526   : > { %p1929_p7 = pnand %p1928_p6, %p2073_p4 }
 0x527   : > { %p1934_p12 = por %p1933_p11, %p1932_p10 }
 0x528   : > { %p1930_p9 = pneg %p1929_p7 }
 0x52a   : > { %p1935_p13 = pnand %p1934_p12, %p1930_p9 }
 0x52c   : > { %1938 = shalt.err (!%p1935_p13)
}
 0x52d   : > { %1821 = dma.vmem_to_hbm [thread:$0]  (%p2073_p4), %s1575_s13, 128, %s2302_s16, %s1560_s17  }
 0x52e PF: > { %p1827_p0 = scmp.ge.s32.totalorder %s1989_s23, 2  ;;  %s1586_s12 = sand.u32 1, %s1969_s18  }
 0x52f   : > { %s1587_s14 = scalar_lea.sflag [#allocation7], %s1586_s12 }
 0x530   : > { %p1824_p1 = pnand %p1827_p0, %p2080_p8 }
 0x532   : > { %p1825_p2 = pneg %p1824_p1 }
 0x534   : > { %1964 = dma.done.wait (%p1825_p2), %s1587_s14, 128  }
 0x535   : > { %1966 = vsyncadd (%p1825_p2), %s1587_s14, 4294967168  ;;  %s18_s23 = sadd.s32 1, %s1989_s23   ;;  %s2351_s18 = smov %s1973_s19 }
 0x536   : > { %p15_p3 = scmp.ge.s32.totalorder %s18_s23, 4   ;;  %s2352_s19 = smov %s1977_s20 }
 0x537   : > { %s2353_s20 = smov %s2086_s6  ;;  %s2354_s21 = smov %s1985_s22 }
 0x538   : > { %s2355_s22 = smov %s2357_s26  ;;  %17 = sbr.rel (!%p15_p3) target bundleno = 4 (0x4), region = 95 }
 0x53d   :  { %1592 = vsyncpa [#allocation7], 1 }
 0x53e   :  { %1594 = vsyncpa [#allocation7 + $0x1], 1 }

</bundles_post_ra>
